<compile_context>
chip_gen: v6e
topology: v6e:2x2x1
jax: 0.10.0
libtpu: 0.0.40
codegen_flags: <defaults>
</compile_context>

<pallas_src>
import functools
import math

import jax
import jax.numpy as jnp
from jax import lax
from jax.experimental import pallas as pl
from jax.experimental.pallas import tpu as pltpu

LN_EPS = 1e-5  # torch nn.LayerNorm default


def _round_up(x, m):
    return ((x + m - 1) // m) * m


# ----------------------------------------------------------------------------
# Hardware introspection (generation-aware VMEM budget, core count)
# ----------------------------------------------------------------------------
@functools.lru_cache(maxsize=1)
def _vmem_cap_budget_cores():
    vmem_cap = 64 * 1024 * 1024  # conservative default (v7x per-TC VMEM)
    cores = 1
    try:
        info = pltpu.get_tpu_info()
        cap = int(getattr(info, "vmem_capacity_bytes", 0) or 0)
        if cap > 0:
            vmem_cap = cap
        for attr in ("num_cores", "core_count", "tensorcores_per_chip",
                     "num_tensorcores"):
            v = getattr(info, attr, None)
            if v:
                cores = int(v)
                break
    except Exception:
        pass
    budget = (vmem_cap * 3) // 4  # ~96 MiB on 128 MiB parts, ~48 MiB on v7x
    return vmem_cap, budget, cores


@functools.lru_cache(maxsize=1)
def _param_pipeline_mode():
    """Probe whether single-buffered (Buffered(1)) resident operands are
    supported; fall back to default double-buffering if not."""
    try:
        def k(a_ref, o_ref):
            o_ref[...] = a_ref[...]

        a = jnp.arange(8 * 128, dtype=jnp.float32).reshape(8, 128)
        out = pl.pallas_call(
            k,
            out_shape=jax.ShapeDtypeStruct((16, 128), jnp.float32),
            grid=(2,),
            in_specs=[pl.BlockSpec((8, 128), lambda i: (0, 0),
                                   pipeline_mode=pl.Buffered(1))],
            out_specs=pl.BlockSpec((8, 128), lambda i: (i, 0)),
        )(a)
        jax.block_until_ready(out)
        return pl.Buffered(1)
    except Exception:
        return None


# ----------------------------------------------------------------------------
# Kernels
# ----------------------------------------------------------------------------
def _ln_relu_block(y, inv_n):
    """ReLU'd pre-activations -> LayerNorm (affine already folded into w2)."""
    mean = jnp.sum(y, axis=-1, keepdims=True) * inv_n
    m2 = jnp.sum(y * y, axis=-1, keepdims=True) * inv_n
    var = jnp.maximum(m2 - mean * mean, 0.0)  # guard one-pass cancellation
    return (y - mean) * lax.rsqrt(var + LN_EPS)


def _make_resident_kernel(num_res_block, ch_mod, mm_dtype):
    """All parameters resident in VMEM; grid iterates batch tiles only."""
    inv_n = 1.0 / float(ch_mod)

    def kernel(x_ref, w_in_ref, b_in_ref, *rest):
        blk = rest[: 4 * num_res_block]
        w_out_ref, b_out_ref, o_ref = rest[4 * num_res_block:]

        h = jnp.dot(x_ref[...].astype(mm_dtype), w_in_ref[...],
                    preferred_element_type=jnp.float32) + b_in_ref[...]

        for i in range(num_res_block):
            w1, b1, w2, b2 = blk[4 * i: 4 * i + 4]
            h_in = h
            y = jnp.dot(h.astype(mm_dtype), w1[...],
                        preferred_element_type=jnp.float32) + b1[...]
            y = jnp.maximum(y, 0.0)
            y = _ln_relu_block(y, inv_n)
            y = jnp.dot(y.astype(mm_dtype), w2[...],
                        preferred_element_type=jnp.float32) + b2[...]
            y = jnp.maximum(y, 0.0)
            # residual add except on the last block (matches torch forward)
            h = y if i == num_res_block - 1 else y + h_in

        out = jnp.dot(h.astype(mm_dtype), w_out_ref[...],
                      preferred_element_type=jnp.float32) + b_out_ref[...]
        o_ref[...] = out.astype(o_ref.dtype)

    return kernel


def _make_streaming_kernel(ch_mod, mm_dtype):
    """Per-block weights streamed over grid axis 1; running activation kept
    in a VMEM scratch accumulator."""
    inv_n = 1.0 / float(ch_mod)

    def kernel(x_ref, w_in_ref, b_in_ref, w1_ref, b1_ref, w2_ref, b2_ref,
               w_out_ref, b_out_ref, o_ref, h_scratch):
        j = pl.program_id(1)
        last = pl.num_programs(1) - 1

        @pl.when(j == 0)
        def _():  # proj_in once per batch tile
            h_scratch[...] = (
                jnp.dot(x_ref[...].astype(mm_dtype), w_in_ref[...],
                        preferred_element_type=jnp.float32) + b_in_ref[...])

        h_in = h_scratch[...]
        y = jnp.dot(h_in.astype(mm_dtype), w1_ref[...],
                    preferred_element_type=jnp.float32) + b1_ref[...]
        y = jnp.maximum(y, 0.0)
        y = _ln_relu_block(y, inv_n)
        y = jnp.dot(y.astype(mm_dtype), w2_ref[...],
                    preferred_element_type=jnp.float32) + b2_ref[...]
        y = jnp.maximum(y, 0.0)

        @pl.when(j != last)
        def _():  # residual add except on the last block
            h_scratch[...] = y + h_in

        @pl.when(j == last)
        def _():  # final projection; output block is resident across j
            out = jnp.dot(y.astype(mm_dtype), w_out_ref[...],
                          preferred_element_type=jnp.float32) + b_out_ref[...]
            o_ref[...] = out.astype(o_ref.dtype)

    return kernel


# ----------------------------------------------------------------------------
# Parameter preparation (one-time, wrapper-side)
# ----------------------------------------------------------------------------
def prepare_resmlp_params(params, *, num_res_block, matmul_dtype=jnp.bfloat16):
    """Pad feature dims to multiples of 128, fold LN affine into the second
    Linear of each block, cast weights to the matmul dtype."""
    w_in, b_in = params[0], params[1]
    w_out, b_out = params[-2], params[-1]
    ch_in, ch_mod = w_in.shape
    out_ch = w_out.shape[1]

    ch_in_p = _round_up(ch_in, 128)
    ch_mod_p = _round_up(ch_mod, 128)
    out_ch_p = _round_up(out_ch, 128)

    def pad2(a, rows, cols):
        return jnp.pad(a, ((0, rows - a.shape[0]), (0, cols - a.shape[1])))

    def as_w(a, rows, cols):   # weights -> matmul dtype (bf16 halves VMEM)
        return pad2(a, rows, cols).astype(matmul_dtype)

    def as_b(a, cols):         # biases stay f32 (added after f32 accumulation)
        return pad2(a, 1, cols).astype(jnp.float32)

    prepped = [as_w(w_in, ch_in_p, ch_mod_p), as_b(b_in, ch_mod_p)]
    for i in range(num_res_block):
        w1, b1, g, beta, w2, b2 = params[2 + 6 * i: 2 + 6 * (i + 1)]
        # Fold LayerNorm affine:  (y*g + beta) @ w2 + b2
        #   = y @ (diag(g) @ w2) + (beta @ w2 + b2)
        w2f = w2 * g.reshape(-1, 1)
        b2f = beta @ w2 + b2
        prepped += [as_w(w1, ch_mod_p, ch_mod_p), as_b(b1, ch_mod_p),
                    as_w(w2f, ch_mod_p, ch_mod_p), as_b(b2f, ch_mod_p)]
    prepped += [as_w(w_out, ch_mod_p, out_ch_p), as_b(b_out, out_ch_p)]

    dims = dict(ch_in=ch_in, ch_mod=ch_mod, out_ch=out_ch,
                ch_in_p=ch_in_p, ch_mod_p=ch_mod_p, out_ch_p=out_ch_p)
    return prepped, dims


# ----------------------------------------------------------------------------
# Batch-tile selection
# ----------------------------------------------------------------------------
def _choose_tile_m(n, tile_m_req, fixed_bytes, per_row_bytes, budget, cores):
    """fixed_bytes: VMEM cost independent of tile_m (resident params).
    per_row_bytes: VMEM cost per batch row (buffers + intermediates)."""
    n8 = _round_up(max(n, 1), 8)
    tm = _round_up(min(tile_m_req, n8), 8)
    # Megacore: only split on multi-TensorCore chips, never below 256 rows.
    if cores > 1 and (n8 // tm) < cores and n8 >= cores * 256:
        tm = _round_up(pl.cdiv(n8, cores), 8)
    # Shrink until the estimate fits; floor at 256 rows when the batch allows
    # (MXU fill/drain amortization), otherwise 8.
    floor = 256 if n8 >= 256 else 8
    while tm > floor and fixed_bytes + tm * per_row_bytes > budget:
        tm = _round_up(max(tm // 2, floor), 8)
    fits = fixed_bytes + tm * per_row_bytes <= budget
    return tm, fits


# ----------------------------------------------------------------------------
# Forward
# ----------------------------------------------------------------------------
def resmlp_forward(x, prepped, *, dims, num_res_block, tile_m=512,
                   matmul_dtype=jnp.bfloat16, out_dtype=jnp.float32,
                   force_streaming=False):
    """x: [N, ch_in].  prepped/dims: from prepare_resmlp_params."""
    n, ch_in = x.shape
    assert ch_in == dims["ch_in"]
    ch_in_p, ch_mod_p, out_ch_p = dims["ch_in_p"], dims["ch_mod_p"], dims["out_ch_p"]

    vmem_cap, budget, cores = _vmem_cap_budget_cores()
    pmode = _param_pipeline_mode()            # pl.Buffered(1) or None
    param_factor = 1 if pmode is not None else 2

    mm_itemsize = jnp.dtype(matmul_dtype).itemsize
    out_itemsize = jnp.dtype(out_dtype).itemsize
    param_bytes = sum(int(p.size) * p.dtype.itemsize for p in prepped)

    # Per-row VMEM: double-buffered x & out blocks + f32/bf16 intermediates,
    # bf16 staging copies and the MXU result tile (generous headroom).
    per_row = (2 * ch_in_p * mm_itemsize
               + 2 * out_ch_p * out_itemsize
               + 8 * ch_mod_p * 4)

    resident_fixed = param_factor * param_bytes
    tm, fits = _choose_tile_m(n, tile_m, resident_fixed, per_row, budget, cores)
    use_streaming = bool(force_streaming) or not fits

    if use_streaming:
        io_bytes = sum(int(p.size) * p.dtype.itemsize
                       for p in (prepped[0], prepped[1], prepped[-2], prepped[-1]))
        # 2 blocks' worth of streamed weights resident (double-buffered).
        blk_bytes = 2 * (2 * ch_mod_p * ch_mod_p * mm_itemsize + 2 * ch_mod_p * 4)
        fixed = param_factor * io_bytes + blk_bytes
        per_row_eff = per_row + ch_mod_p * 4          # + h scratch
        tm, _ = _choose_tile_m(n, tile_m, fixed, per_row_eff, budget, cores)
    else:
        fixed, per_row_eff = resident_fixed, per_row

    n_pad = _round_up(n, tm)
    x_p = jnp.pad(x, ((0, n_pad - n), (0, ch_in_p - ch_in))).astype(matmul_dtype)

    need = fixed + tm * per_row_eff
    vmem_limit = int(min(vmem_cap, max(need + (16 << 20), 48 << 20)))

    flops = 2 * n_pad * (ch_in_p * ch_mod_p
                         + 2 * num_res_block * ch_mod_p * ch_mod_p
                         + ch_mod_p * out_ch_p)
    cost = pl.CostEstimate(
        flops=flops,
        transcendentals=n_pad * num_res_block,  # one rsqrt per row per block
        bytes_accessed=(int(x_p.size) * mm_itemsize
                        + n_pad * out_ch_p * out_itemsize + param_bytes))

    if not use_streaming:
        kernel = _make_resident_kernel(num_res_block, dims["ch_mod"], matmul_dtype)
        x_spec = pl.BlockSpec((tm, ch_in_p), lambda i: (i, 0))
        param_specs = [pl.BlockSpec(p.shape, lambda i: (0, 0), pipeline_mode=pmode)
                       for p in prepped]
        out_spec = pl.BlockSpec((tm, out_ch_p), lambda i: (i, 0))

        out_p = pl.pallas_call(
            kernel,
            out_shape=jax.ShapeDtypeStruct((n_pad, out_ch_p), out_dtype),
            grid_spec=pltpu.PrefetchScalarGridSpec(
                num_scalar_prefetch=0,
                grid=(n_pad // tm,),
                in_specs=[x_spec] + param_specs,
                out_specs=out_spec,
            ),
            compiler_params=pltpu.CompilerParams(
                dimension_semantics=("parallel",),
                vmem_limit_bytes=vmem_limit),
            cost_estimate=cost,
        )(x_p, *prepped)
    else:
        # Stack per-block params -> [num_res_block, ...] for the streaming axis.
        w_in, b_in = prepped[0], prepped[1]
        w_out, b_out = prepped[-2], prepped[-1]
        blk = prepped[2:-2]
        w1s = jnp.stack(blk[0::4]); b1s = jnp.stack(blk[1::4])
        w2s = jnp.stack(blk[2::4]); b2s = jnp.stack(blk[3::4])

        kernel = _make_streaming_kernel(dims["ch_mod"], matmul_dtype)
        in_specs = [
            pl.BlockSpec((tm, ch_in_p), lambda i, j: (i, 0)),
            pl.BlockSpec(w_in.shape, lambda i, j: (0, 0), pipeline_mode=pmode),
            pl.BlockSpec(b_in.shape, lambda i, j: (0, 0), pipeline_mode=pmode),
            pl.BlockSpec((None, ch_mod_p, ch_mod_p), lambda i, j: (j, 0, 0)),
            pl.BlockSpec((None, 1, ch_mod_p), lambda i, j: (j, 0, 0)),
            pl.BlockSpec((None, ch_mod_p, ch_mod_p), lambda i, j: (j, 0, 0)),
            pl.BlockSpec((None, 1, ch_mod_p), lambda i, j: (j, 0, 0)),
            pl.BlockSpec(w_out.shape, lambda i, j: (0, 0), pipeline_mode=pmode),
            pl.BlockSpec(b_out.shape, lambda i, j: (0, 0), pipeline_mode=pmode),
        ]
        out_spec = pl.BlockSpec((tm, out_ch_p), lambda i, j: (i, 0))

        out_p = pl.pallas_call(
            kernel,
            out_shape=jax.ShapeDtypeStruct((n_pad, out_ch_p), out_dtype),
            grid_spec=pltpu.PrefetchScalarGridSpec(
                num_scalar_prefetch=0,
                grid=(n_pad // tm, num_res_block),
                in_specs=in_specs,
                out_specs=out_spec,
                scratch_shapes=[pltpu.VMEM((tm, ch_mod_p), jnp.float32)],
            ),
            compiler_params=pltpu.CompilerParams(
                dimension_semantics=("parallel", "arbitrary"),
                vmem_limit_bytes=vmem_limit),
            cost_estimate=cost,
        )(x_p, w_in, b_in, w1s, b1s, w2s, b2s, w_out, b_out)

    return out_p[:n, :dims["out_ch"]]


# ----------------------------------------------------------------------------
# Parameter init (torch-like shapes) + pure-JAX reference
# ----------------------------------------------------------------------------
def init_resmlp_params(key, ch_in, ch_mod, out_ch, num_res_block):
    """Deterministic synthetic parameters (same shapes as the torch module).
    Linear weights stored as (in_features, out_features)."""
    keys = jax.random.split(key, 4 + 4 * num_res_block)
    k = iter(keys)

    def linear(kk, fan_in, fan_out):
        return jax.random.normal(kk, (fan_in, fan_out), jnp.float32) * (1.0 / math.sqrt(fan_in))

    params = []
    params.append(linear(next(k), ch_in, ch_mod))
    params.append(jax.random.normal(next(k), (1, ch_mod), jnp.float32) * 0.01)
    for _ in range(num_res_block):
        params.append(linear(next(k), ch_mod, ch_mod))
        params.append(jax.random.normal(next(k), (1, ch_mod), jnp.float32) * 0.01)
        params.append(jnp.ones((1, ch_mod), jnp.float32))   # LayerNorm gamma
        params.append(jnp.zeros((1, ch_mod), jnp.float32))  # LayerNorm beta
        params.append(linear(next(k), ch_mod, ch_mod))
        params.append(jax.random.normal(next(k), (1, ch_mod), jnp.float32) * 0.01)
    params.append(linear(next(k), ch_mod, out_ch))
    params.append(jax.random.normal(next(k), (1, out_ch), jnp.float32) * 0.01)
    return params


def resmlp_reference(x, params, *, num_res_block):
    """Pure-JAX reference mirroring the torch forward exactly."""
    w_in, b_in = params[0], params[1]
    h = x @ w_in + b_in
    for i in range(num_res_block):
        w1, b1, g, b, w2, b2 = params[2 + i * 6: 2 + (i + 1) * 6]
        h_in = h
        y = jnp.maximum(h @ w1 + b1, 0.0)
        mean = jnp.mean(y, axis=-1, keepdims=True)
        var = jnp.mean((y - mean) ** 2, axis=-1, keepdims=True)
        y = (y - mean) / jnp.sqrt(var + LN_EPS) * g + b
        y = jnp.maximum(y @ w2 + b2, 0.0)
        h = y if i == num_res_block - 1 else y + h_in
    w_out, b_out = params[-2], params[-1]
    return h @ w_out + b_out


# ----------------------------------------------------------------------------
if __name__ == "__main__":
    ch_in, ch_mod, out_ch = 16, 32, 8
    num_res_block = 2
    batch = 8

    key = jax.random.PRNGKey(0)
    kx, kp = jax.random.split(key)
    x = jax.random.normal(kx, (batch, ch_in), jnp.float32)
    params = init_resmlp_params(kp, ch_in, ch_mod, out_ch, num_res_block)
    ref = resmlp_reference(x, params, num_res_block=num_res_block)

    # --- f32 matmul, resident-weights path: tight check ----------------------
    prepped_f32, dims = prepare_resmlp_params(
        params, num_res_block=num_res_block, matmul_dtype=jnp.float32)
    fwd_f32 = jax.jit(functools.partial(
        resmlp_forward, dims=dims, num_res_block=num_res_block,
        tile_m=512, matmul_dtype=jnp.float32))
    out_f32 = fwd_f32(x, prepped_f32)
    jax.block_until_ready(out_f32)
    assert out_f32.shape == (batch, out_ch)
    assert jnp.allclose(out_f32, ref, atol=1e-4, rtol=1e-4), "f32 resident mismatch"

    # --- f32 matmul, forced weight-streaming path: tight check ---------------
    fwd_stream = jax.jit(functools.partial(
        resmlp_forward, dims=dims, num_res_block=num_res_block,
        tile_m=512, matmul_dtype=jnp.float32, force_streaming=True))
    out_stream = fwd_stream(x, prepped_f32)
    jax.block_until_ready(out_stream)
    assert out_stream.shape == (batch, out_ch)
    assert jnp.allclose(out_stream, ref, atol=1e-4, rtol=1e-4), "streaming mismatch"

    # --- bf16 matmul (production fast path): relaxed tolerance ---------------
    prepped_bf16, dims_b = prepare_resmlp_params(
        params, num_res_block=num_res_block, matmul_dtype=jnp.bfloat16)
    fwd_bf16 = jax.jit(functools.partial(
        resmlp_forward, dims=dims_b, num_res_block=num_res_block,
        tile_m=512, matmul_dtype=jnp.bfloat16))
    out_bf16 = fwd_bf16(x, prepped_bf16)
    jax.block_until_ready(out_bf16)
    assert out_bf16.shape == (batch, out_ch)
    assert jnp.allclose(out_bf16, ref, atol=2e-1, rtol=5e-2), "bf16 mismatch"

    print("KERNEL_OK")
</pallas_src>

<mosaic_0001>
module attributes {stable_mosaic.version = 11 : i64} {
  func.func @kernel(%arg0: i32, %arg1: memref<8x128xf32, #tpu.memory_space<vmem>>, %arg2: memref<128x128xf32, #tpu.memory_space<vmem>>, %arg3: memref<1x128xf32, #tpu.memory_space<vmem>>, %arg4: memref<128x128xf32, #tpu.memory_space<vmem>>, %arg5: memref<1x128xf32, #tpu.memory_space<vmem>>, %arg6: memref<128x128xf32, #tpu.memory_space<vmem>>, %arg7: memref<1x128xf32, #tpu.memory_space<vmem>>, %arg8: memref<128x128xf32, #tpu.memory_space<vmem>>, %arg9: memref<1x128xf32, #tpu.memory_space<vmem>>, %arg10: memref<128x128xf32, #tpu.memory_space<vmem>>, %arg11: memref<1x128xf32, #tpu.memory_space<vmem>>, %arg12: memref<128x128xf32, #tpu.memory_space<vmem>>, %arg13: memref<1x128xf32, #tpu.memory_space<vmem>>, %arg14: memref<8x128xf32, #tpu.memory_space<vmem>>) attributes {dimension_semantics = [#tpu.dimension_semantics<parallel>], iteration_bounds = array<i64: 1>, scalar_prefetch = 0 : i64, scratch_operands = 0 : i64, tpu.core_type = #tpu.core_type<tc>, window_params = [{transform_indices = @transform_0, window_bounds = array<i64: 8, 128>}, {pipeline_mode = #tpu.pipeline_mode<synchronous>, transform_indices = @transform_1, window_bounds = array<i64: 128, 128>}, {pipeline_mode = #tpu.pipeline_mode<synchronous>, transform_indices = @transform_2, window_bounds = array<i64: 1, 128>}, {pipeline_mode = #tpu.pipeline_mode<synchronous>, transform_indices = @transform_3, window_bounds = array<i64: 128, 128>}, {pipeline_mode = #tpu.pipeline_mode<synchronous>, transform_indices = @transform_4, window_bounds = array<i64: 1, 128>}, {pipeline_mode = #tpu.pipeline_mode<synchronous>, transform_indices = @transform_5, window_bounds = array<i64: 128, 128>}, {pipeline_mode = #tpu.pipeline_mode<synchronous>, transform_indices = @transform_6, window_bounds = array<i64: 1, 128>}, {pipeline_mode = #tpu.pipeline_mode<synchronous>, transform_indices = @transform_7, window_bounds = array<i64: 128, 128>}, {pipeline_mode = #tpu.pipeline_mode<synchronous>, transform_indices = @transform_8, window_bounds = array<i64: 1, 128>}, {pipeline_mode = #tpu.pipeline_mode<synchronous>, transform_indices = @transform_9, window_bounds = array<i64: 128, 128>}, {pipeline_mode = #tpu.pipeline_mode<synchronous>, transform_indices = @transform_10, window_bounds = array<i64: 1, 128>}, {pipeline_mode = #tpu.pipeline_mode<synchronous>, transform_indices = @transform_11, window_bounds = array<i64: 128, 128>}, {pipeline_mode = #tpu.pipeline_mode<synchronous>, transform_indices = @transform_12, window_bounds = array<i64: 1, 128>}, {transform_indices = @transform_13, window_bounds = array<i64: 8, 128>}]} {
    %c0 = arith.constant 0 : index
    %c0_0 = arith.constant 0 : index
    %0 = vector.load %arg1[%c0, %c0_0] : memref<8x128xf32, #tpu.memory_space<vmem>>, vector<8x128xf32>
    %c0_1 = arith.constant 0 : index
    %c0_2 = arith.constant 0 : index
    %1 = vector.load %arg2[%c0_1, %c0_2] : memref<128x128xf32, #tpu.memory_space<vmem>>, vector<128x128xf32>
    %cst = arith.constant dense<0.000000e+00> : vector<8x128xf32>
    %2 = tpu.matmul %0, %1, %cst {dimension_numbers = #tpu.dot_dimension_numbers<[1], [0], [0], [1], [0, 0, 1, 1], [], []>} : vector<8x128xf32>, vector<128x128xf32>, vector<8x128xf32> -> vector<8x128xf32>
    %c0_3 = arith.constant 0 : index
    %c0_4 = arith.constant 0 : index
    %3 = vector.load %arg3[%c0_3, %c0_4] : memref<1x128xf32, #tpu.memory_space<vmem>>, vector<1x128xf32>
    %4 = vector.broadcast %3 : vector<1x128xf32> to vector<8x128xf32>
    %5 = arith.addf %2, %4 : vector<8x128xf32>
    %c0_5 = arith.constant 0 : index
    %c0_6 = arith.constant 0 : index
    %6 = vector.load %arg4[%c0_5, %c0_6] : memref<128x128xf32, #tpu.memory_space<vmem>>, vector<128x128xf32>
    %cst_7 = arith.constant dense<0.000000e+00> : vector<8x128xf32>
    %7 = tpu.matmul %5, %6, %cst_7 {dimension_numbers = #tpu.dot_dimension_numbers<[1], [0], [0], [1], [0, 0, 1, 1], [], []>} : vector<8x128xf32>, vector<128x128xf32>, vector<8x128xf32> -> vector<8x128xf32>
    %c0_8 = arith.constant 0 : index
    %c0_9 = arith.constant 0 : index
    %8 = vector.load %arg5[%c0_8, %c0_9] : memref<1x128xf32, #tpu.memory_space<vmem>>, vector<1x128xf32>
    %9 = vector.broadcast %8 : vector<1x128xf32> to vector<8x128xf32>
    %10 = arith.addf %7, %9 : vector<8x128xf32>
    %cst_10 = arith.constant 0.000000e+00 : f32
    %11 = vector.broadcast %cst_10 : f32 to vector<8x128xf32>
    %12 = arith.maximumf %10, %11 : vector<8x128xf32>
    %cst_11 = arith.constant dense<0.000000e+00> : vector<8xf32>
    %13 = vector.multi_reduction <add>, %12, %cst_11 [1] : vector<8x128xf32> to vector<8xf32>
    %14 = vector.shape_cast %13 : vector<8xf32> to vector<8x1xf32>
    %cst_12 = arith.constant 3.125000e-02 : f32
    %15 = vector.broadcast %cst_12 : f32 to vector<8x1xf32>
    %16 = arith.mulf %14, %15 : vector<8x1xf32>
    %17 = arith.mulf %12, %12 : vector<8x128xf32>
    %cst_13 = arith.constant dense<0.000000e+00> : vector<8xf32>
    %18 = vector.multi_reduction <add>, %17, %cst_13 [1] : vector<8x128xf32> to vector<8xf32>
    %19 = vector.shape_cast %18 : vector<8xf32> to vector<8x1xf32>
    %cst_14 = arith.constant 3.125000e-02 : f32
    %20 = vector.broadcast %cst_14 : f32 to vector<8x1xf32>
    %21 = arith.mulf %19, %20 : vector<8x1xf32>
    %22 = arith.mulf %16, %16 : vector<8x1xf32>
    %23 = arith.subf %21, %22 : vector<8x1xf32>
    %cst_15 = arith.constant 0.000000e+00 : f32
    %24 = vector.broadcast %cst_15 : f32 to vector<8x1xf32>
    %25 = arith.maximumf %23, %24 : vector<8x1xf32>
    %26 = vector.broadcast %16 : vector<8x1xf32> to vector<8x128xf32>
    %27 = arith.subf %12, %26 : vector<8x128xf32>
    %cst_16 = arith.constant 9.99999974E-6 : f32
    %28 = vector.broadcast %cst_16 : f32 to vector<8x1xf32>
    %29 = arith.addf %25, %28 : vector<8x1xf32>
    %30 = math.rsqrt %29 : vector<8x1xf32>
    %31 = vector.broadcast %30 : vector<8x1xf32> to vector<8x128xf32>
    %32 = arith.mulf %27, %31 : vector<8x128xf32>
    %c0_17 = arith.constant 0 : index
    %c0_18 = arith.constant 0 : index
    %33 = vector.load %arg6[%c0_17, %c0_18] : memref<128x128xf32, #tpu.memory_space<vmem>>, vector<128x128xf32>
    %cst_19 = arith.constant dense<0.000000e+00> : vector<8x128xf32>
    %34 = tpu.matmul %32, %33, %cst_19 {dimension_numbers = #tpu.dot_dimension_numbers<[1], [0], [0], [1], [0, 0, 1, 1], [], []>} : vector<8x128xf32>, vector<128x128xf32>, vector<8x128xf32> -> vector<8x128xf32>
    %c0_20 = arith.constant 0 : index
    %c0_21 = arith.constant 0 : index
    %35 = vector.load %arg7[%c0_20, %c0_21] : memref<1x128xf32, #tpu.memory_space<vmem>>, vector<1x128xf32>
    %36 = vector.broadcast %35 : vector<1x128xf32> to vector<8x128xf32>
    %37 = arith.addf %34, %36 : vector<8x128xf32>
    %cst_22 = arith.constant 0.000000e+00 : f32
    %38 = vector.broadcast %cst_22 : f32 to vector<8x128xf32>
    %39 = arith.maximumf %37, %38 : vector<8x128xf32>
    %40 = arith.addf %39, %5 : vector<8x128xf32>
    %c0_23 = arith.constant 0 : index
    %c0_24 = arith.constant 0 : index
    %41 = vector.load %arg8[%c0_23, %c0_24] : memref<128x128xf32, #tpu.memory_space<vmem>>, vector<128x128xf32>
    %cst_25 = arith.constant dense<0.000000e+00> : vector<8x128xf32>
    %42 = tpu.matmul %40, %41, %cst_25 {dimension_numbers = #tpu.dot_dimension_numbers<[1], [0], [0], [1], [0, 0, 1, 1], [], []>} : vector<8x128xf32>, vector<128x128xf32>, vector<8x128xf32> -> vector<8x128xf32>
    %c0_26 = arith.constant 0 : index
    %c0_27 = arith.constant 0 : index
    %43 = vector.load %arg9[%c0_26, %c0_27] : memref<1x128xf32, #tpu.memory_space<vmem>>, vector<1x128xf32>
    %44 = vector.broadcast %43 : vector<1x128xf32> to vector<8x128xf32>
    %45 = arith.addf %42, %44 : vector<8x128xf32>
    %cst_28 = arith.constant 0.000000e+00 : f32
    %46 = vector.broadcast %cst_28 : f32 to vector<8x128xf32>
    %47 = arith.maximumf %45, %46 : vector<8x128xf32>
    %cst_29 = arith.constant dense<0.000000e+00> : vector<8xf32>
    %48 = vector.multi_reduction <add>, %47, %cst_29 [1] : vector<8x128xf32> to vector<8xf32>
    %49 = vector.shape_cast %48 : vector<8xf32> to vector<8x1xf32>
    %cst_30 = arith.constant 3.125000e-02 : f32
    %50 = vector.broadcast %cst_30 : f32 to vector<8x1xf32>
    %51 = arith.mulf %49, %50 : vector<8x1xf32>
    %52 = arith.mulf %47, %47 : vector<8x128xf32>
    %cst_31 = arith.constant dense<0.000000e+00> : vector<8xf32>
    %53 = vector.multi_reduction <add>, %52, %cst_31 [1] : vector<8x128xf32> to vector<8xf32>
    %54 = vector.shape_cast %53 : vector<8xf32> to vector<8x1xf32>
    %cst_32 = arith.constant 3.125000e-02 : f32
    %55 = vector.broadcast %cst_32 : f32 to vector<8x1xf32>
    %56 = arith.mulf %54, %55 : vector<8x1xf32>
    %57 = arith.mulf %51, %51 : vector<8x1xf32>
    %58 = arith.subf %56, %57 : vector<8x1xf32>
    %cst_33 = arith.constant 0.000000e+00 : f32
    %59 = vector.broadcast %cst_33 : f32 to vector<8x1xf32>
    %60 = arith.maximumf %58, %59 : vector<8x1xf32>
    %61 = vector.broadcast %51 : vector<8x1xf32> to vector<8x128xf32>
    %62 = arith.subf %47, %61 : vector<8x128xf32>
    %cst_34 = arith.constant 9.99999974E-6 : f32
    %63 = vector.broadcast %cst_34 : f32 to vector<8x1xf32>
    %64 = arith.addf %60, %63 : vector<8x1xf32>
    %65 = math.rsqrt %64 : vector<8x1xf32>
    %66 = vector.broadcast %65 : vector<8x1xf32> to vector<8x128xf32>
    %67 = arith.mulf %62, %66 : vector<8x128xf32>
    %c0_35 = arith.constant 0 : index
    %c0_36 = arith.constant 0 : index
    %68 = vector.load %arg10[%c0_35, %c0_36] : memref<128x128xf32, #tpu.memory_space<vmem>>, vector<128x128xf32>
    %cst_37 = arith.constant dense<0.000000e+00> : vector<8x128xf32>
    %69 = tpu.matmul %67, %68, %cst_37 {dimension_numbers = #tpu.dot_dimension_numbers<[1], [0], [0], [1], [0, 0, 1, 1], [], []>} : vector<8x128xf32>, vector<128x128xf32>, vector<8x128xf32> -> vector<8x128xf32>
    %c0_38 = arith.constant 0 : index
    %c0_39 = arith.constant 0 : index
    %70 = vector.load %arg11[%c0_38, %c0_39] : memref<1x128xf32, #tpu.memory_space<vmem>>, vector<1x128xf32>
    %71 = vector.broadcast %70 : vector<1x128xf32> to vector<8x128xf32>
    %72 = arith.addf %69, %71 : vector<8x128xf32>
    %cst_40 = arith.constant 0.000000e+00 : f32
    %73 = vector.broadcast %cst_40 : f32 to vector<8x128xf32>
    %74 = arith.maximumf %72, %73 : vector<8x128xf32>
    %c0_41 = arith.constant 0 : index
    %c0_42 = arith.constant 0 : index
    %75 = vector.load %arg12[%c0_41, %c0_42] : memref<128x128xf32, #tpu.memory_space<vmem>>, vector<128x128xf32>
    %cst_43 = arith.constant dense<0.000000e+00> : vector<8x128xf32>
    %76 = tpu.matmul %74, %75, %cst_43 {dimension_numbers = #tpu.dot_dimension_numbers<[1], [0], [0], [1], [0, 0, 1, 1], [], []>} : vector<8x128xf32>, vector<128x128xf32>, vector<8x128xf32> -> vector<8x128xf32>
    %c0_44 = arith.constant 0 : index
    %c0_45 = arith.constant 0 : index
    %77 = vector.load %arg13[%c0_44, %c0_45] : memref<1x128xf32, #tpu.memory_space<vmem>>, vector<1x128xf32>
    %78 = vector.broadcast %77 : vector<1x128xf32> to vector<8x128xf32>
    %79 = arith.addf %76, %78 : vector<8x128xf32>
    %c0_46 = arith.constant 0 : index
    %c0_47 = arith.constant 0 : index
    %80 = vector.load %arg14[%c0_46, %c0_47] : memref<8x128xf32, #tpu.memory_space<vmem>>, vector<8x128xf32>
    tpu.vector_store %arg14[%c0_46, %c0_47], %79 {strides = array<i32>} : memref<8x128xf32, #tpu.memory_space<vmem>>, vector<8x128xf32>,
    return
  }
  func.func @transform_0(%arg0: i32) -> (i32, i32) {
    %c0_i32 = arith.constant 0 : i32
    %c0_i32_0 = arith.constant 0 : i32
    return %arg0, %c0_i32 : i32, i32
  }
  func.func @transform_1(%arg0: i32) -> (i32, i32) {
    %c0_i32 = arith.constant 0 : i32
    %c0_i32_0 = arith.constant 0 : i32
    %c0_i32_1 = arith.constant 0 : i32
    return %c0_i32, %c0_i32_0 : i32, i32
  }
  func.func @transform_2(%arg0: i32) -> (i32, i32) {
    %c0_i32 = arith.constant 0 : i32
    %c0_i32_0 = arith.constant 0 : i32
    %c0_i32_1 = arith.constant 0 : i32
    return %c0_i32, %c0_i32_0 : i32, i32
  }
  func.func @transform_3(%arg0: i32) -> (i32, i32) {
    %c0_i32 = arith.constant 0 : i32
    %c0_i32_0 = arith.constant 0 : i32
    %c0_i32_1 = arith.constant 0 : i32
    return %c0_i32, %c0_i32_0 : i32, i32
  }
  func.func @transform_4(%arg0: i32) -> (i32, i32) {
    %c0_i32 = arith.constant 0 : i32
    %c0_i32_0 = arith.constant 0 : i32
    %c0_i32_1 = arith.constant 0 : i32
    return %c0_i32, %c0_i32_0 : i32, i32
  }
  func.func @transform_5(%arg0: i32) -> (i32, i32) {
    %c0_i32 = arith.constant 0 : i32
    %c0_i32_0 = arith.constant 0 : i32
    %c0_i32_1 = arith.constant 0 : i32
    return %c0_i32, %c0_i32_0 : i32, i32
  }
  func.func @transform_6(%arg0: i32) -> (i32, i32) {
    %c0_i32 = arith.constant 0 : i32
    %c0_i32_0 = arith.constant 0 : i32
    %c0_i32_1 = arith.constant 0 : i32
    return %c0_i32, %c0_i32_0 : i32, i32
  }
  func.func @transform_7(%arg0: i32) -> (i32, i32) {
    %c0_i32 = arith.constant 0 : i32
    %c0_i32_0 = arith.constant 0 : i32
    %c0_i32_1 = arith.constant 0 : i32
    return %c0_i32, %c0_i32_0 : i32, i32
  }
  func.func @transform_8(%arg0: i32) -> (i32, i32) {
    %c0_i32 = arith.constant 0 : i32
    %c0_i32_0 = arith.constant 0 : i32
    %c0_i32_1 = arith.constant 0 : i32
    return %c0_i32, %c0_i32_0 : i32, i32
  }
  func.func @transform_9(%arg0: i32) -> (i32, i32) {
    %c0_i32 = arith.constant 0 : i32
    %c0_i32_0 = arith.constant 0 : i32
    %c0_i32_1 = arith.constant 0 : i32
    return %c0_i32, %c0_i32_0 : i32, i32
  }
  func.func @transform_10(%arg0: i32) -> (i32, i32) {
    %c0_i32 = arith.constant 0 : i32
    %c0_i32_0 = arith.constant 0 : i32
    %c0_i32_1 = arith.constant 0 : i32
    return %c0_i32, %c0_i32_0 : i32, i32
  }
  func.func @transform_11(%arg0: i32) -> (i32, i32) {
    %c0_i32 = arith.constant 0 : i32
    %c0_i32_0 = arith.constant 0 : i32
    %c0_i32_1 = arith.constant 0 : i32
    return %c0_i32, %c0_i32_0 : i32, i32
  }
  func.func @transform_12(%arg0: i32) -> (i32, i32) {
    %c0_i32 = arith.constant 0 : i32
    %c0_i32_0 = arith.constant 0 : i32
    %c0_i32_1 = arith.constant 0 : i32
    return %c0_i32, %c0_i32_0 : i32, i32
  }
  func.func @transform_13(%arg0: i32) -> (i32, i32) {
    %c0_i32 = arith.constant 0 : i32
    %c0_i32_0 = arith.constant 0 : i32
    return %arg0, %c0_i32 : i32, i32
  }
}

</mosaic_0001>

<bundles_post_ra>
// kernel: resmlp_forward.1
= control target key start
LH: loop header
LB: loop body
LE: loop exit
PB: predicated region body
PF: predicated region fallthrough
CT: control target
= control target key end

     0   :  { %18 = vsyncpa [#allocation3], 0  ;;  %s1486_s0 = inlined_call_operand.vmem [shape: f32[8,128], index: 0, kind: input, shape index: {}]   ;;  %s1487_s1 = inlined_call_operand.hbm [shape: f32[128,128], index: 1, kind: input, shape index: {}]   ;;  %s1488_s2 = inlined_call_operand.vmem [shape: f32[1,128], index: 2, kind: input, shape index: {}]   ;;  %s1489_s3 = inlined_call_operand.hbm [shape: f32[128,128], index: 3, kind: input, shape index: {}]   ;;  %s1490_s4 = inlined_call_operand.vmem [shape: f32[1,128], index: 4, kind: input, shape index: {}]   ;;  %s1491_s5 = inlined_call_operand.hbm [shape: f32[128,128], index: 5, kind: input, shape index: {}]   ;;  %s1492_s6 = inlined_call_operand.vmem [shape: f32[1,128], index: 6, kind: input, shape index: {}]   ;;  %s1493_s7 = inlined_call_operand.hbm [shape: f32[128,128], index: 7, kind: input, shape index: {}]   ;;  %s1494_s8 = inlined_call_operand.vmem [shape: f32[1,128], index: 8, kind: input, shape index: {}]   ;;  %s1495_s9 = inlined_call_operand.hbm [shape: f32[128,128], index: 9, kind: input, shape index: {}]   ;;  %s1496_s10 = inlined_call_operand.vmem [shape: f32[1,128], index: 10, kind: input, shape index: {}]   ;;  %s1497_s11 = inlined_call_operand.hbm [shape: f32[128,128], index: 11, kind: input, shape index: {}]   ;;  %s1498_s12 = inlined_call_operand.vmem [shape: f32[1,128], index: 12, kind: input, shape index: {}]   ;;  %s1499_s13 = inlined_call_operand.hbm [shape: f32[8,128], index: 13, kind: output, shape index: {}]  }
   0x1   :  { %19 = vsyncpa [#allocation6], 0 }
   0x2   :  { %20 = vsyncpa [#allocation9], 0 }
   0x3   :  { %21 = vsyncpa [#allocation12], 0 }
   0x4   :  { %22 = vsyncpa [#allocation4], 0  ;;  %s1221_s25 = smov [#allocation5]   ;;  %s1222_s27 = smov [#allocation8]  }
   0x5   :  { %s44_s26 = sshll.u32 %s1221_s25, 4  ;;  %s72_s28 = sshll.u32 %s1222_s27, 4  ;;  %s45_s26 = int_to_ptr.vmem [resolvable:$true] %s44_s26  ;;  %s73_s28 = int_to_ptr.vmem [resolvable:$true] %s72_s28 }
   0x6   :  { %s1079_s29 = scalar_lea.vmem %s45_s26, 2048  ;;  %p1084_p1 = scmp.lt.s32.totalorder %s45_s26, %s45_s26 }
   0x7   :  { %p1080_p0 = scmp.ne.s32.totalorder %s45_s26, %s1079_s29  ;;  %p1085_p2 = scmp.lt.s32.totalorder %s1079_s29, %s1079_s29 }
   0x9   :  { %p1086_p3 = por %p1085_p2, %p1084_p1 }
   0xb   :  { %p1087_p4 = pnand %p1086_p3, %p1080_p0 }
   0xd   :  { %1090 = shalt.err (!%p1087_p4)
}
   0xe   :  { %s1223_s30 = smov 128   ;;  %s1224_s14 = smov 8  }
   0xf   :  { %50 = dma.hbm_to_vmem [thread:$0]  %s1489_s3, 2048, %s45_s26, [#allocation6], %s1223_s30, %s1223_s30, %s1224_s14  }
  0x10   :  { %s1099_s17 = scalar_lea.vmem %s73_s28, 2048  ;;  %p1104_p6 = scmp.lt.s32.totalorder %s73_s28, %s73_s28 }
  0x11   :  { %p1100_p5 = scmp.ne.s32.totalorder %s73_s28, %s1099_s17  ;;  %p1105_p7 = scmp.lt.s32.totalorder %s1099_s17, %s1099_s17 }
  0x13   :  { %p1106_p8 = por %p1105_p7, %p1104_p6 }
  0x15   :  { %p1107_p9 = pnand %p1106_p8, %p1100_p5 }
  0x17   :  { %1110 = shalt.err (!%p1107_p9)
}
  0x18   :  { %78 = dma.hbm_to_vmem [thread:$0]  %s1493_s7, 2048, %s73_s28, [#allocation9], %s1223_s30, %s1223_s30, %s1224_s14  }
  0x19   :  { %s1225_s20 = smov [#allocation2]   ;;  %s1226_s22 = smov [#allocation7]  }
  0x1a   :  { %s30_s21 = sshll.u32 %s1225_s20, 4  ;;  %s58_s23 = sshll.u32 %s1226_s22, 4  ;;  %s31_s21 = int_to_ptr.vmem [resolvable:$true] %s30_s21  ;;  %s59_s23 = int_to_ptr.vmem [resolvable:$true] %s58_s23 }
  0x1b   :  { %s1119_s3 = scalar_lea.vmem %s31_s21, 2048  ;;  %p1124_p11 = scmp.lt.s32.totalorder %s31_s21, %s31_s21 }
  0x1c   :  { %p1120_p10 = scmp.ne.s32.totalorder %s31_s21, %s1119_s3  ;;  %p1125_p12 = scmp.lt.s32.totalorder %s1119_s3, %s1119_s3 }
  0x1e   :  { %p1126_p13 = por %p1125_p12, %p1124_p11 }
  0x20   :  { %p1127_p0 = pnand %p1126_p13, %p1120_p10 }
  0x22   :  { %1130 = shalt.err (!%p1127_p0)
}
  0x23   :  { %36 = dma.hbm_to_vmem [thread:$0]  %s1487_s1, 2048, %s31_s21, [#allocation3], %s1223_s30, %s1223_s30, %s1224_s14  }
  0x24   :  { %s1139_s7 = scalar_lea.vmem %s59_s23, 2048  ;;  %p1144_p2 = scmp.lt.s32.totalorder %s59_s23, %s59_s23 }
  0x25   :  { %p1140_p1 = scmp.ne.s32.totalorder %s59_s23, %s1139_s7  ;;  %p1145_p3 = scmp.lt.s32.totalorder %s1139_s7, %s1139_s7 }
  0x27   :  { %p1146_p4 = por %p1145_p3, %p1144_p2 }
  0x29   :  { %p1147_p5 = pnand %p1146_p4, %p1140_p1 }
  0x2b   :  { %1150 = shalt.err (!%p1147_p5)
}
  0x2c   :  { %64 = dma.hbm_to_vmem [thread:$0]  %s1491_s5, 2048, %s59_s23, [#allocation6], %s1223_s30, %s1223_s30, %s1224_s14  }
  0x2d   :  { %s1227_s28 = smov [#allocation10]   ;;  %s1228_s15 = smov [#allocation11]  }
  0x2e   :  { %s86_s29 = sshll.u32 %s1227_s28, 4  ;;  %s100_s16 = sshll.u32 %s1228_s15, 4  ;;  %s87_s29 = int_to_ptr.vmem [resolvable:$true] %s86_s29  ;;  %s101_s16 = int_to_ptr.vmem [resolvable:$true] %s100_s16 }
  0x2f   :  { %s1159_s1 = scalar_lea.vmem %s87_s29, 2048  ;;  %p1164_p7 = scmp.lt.s32.totalorder %s87_s29, %s87_s29 }
  0x30   :  { %p1160_p6 = scmp.ne.s32.totalorder %s87_s29, %s1159_s1  ;;  %p1165_p8 = scmp.lt.s32.totalorder %s1159_s1, %s1159_s1 }
  0x32   :  { %p1166_p9 = por %p1165_p8, %p1164_p7 }
  0x34   :  { %p1167_p10 = pnand %p1166_p9, %p1160_p6 }
  0x36   :  { %1170 = shalt.err (!%p1167_p10)
}
  0x37   :  { %92 = dma.hbm_to_vmem [thread:$0]  %s1495_s9, 2048, %s87_s29, [#allocation9], %s1223_s30, %s1223_s30, %s1224_s14  }
  0x38   :  { %s1179_s5 = scalar_lea.vmem %s101_s16, 2048  ;;  %p1184_p12 = scmp.lt.s32.totalorder %s101_s16, %s101_s16 }
  0x39   :  { %p1180_p11 = scmp.ne.s32.totalorder %s101_s16, %s1179_s5  ;;  %p1185_p13 = scmp.lt.s32.totalorder %s1179_s5, %s1179_s5 }
  0x3b   :  { %p1186_p0 = por %p1185_p13, %p1184_p12 }
  0x3d   :  { %p1187_p1 = pnand %p1186_p0, %p1180_p11 }
  0x3f   :  { %1190 = shalt.err (!%p1187_p1)
}
  0x40   :  { %106 = dma.hbm_to_vmem [thread:$0]  %s1497_s11, 2048, %s101_s16, [#allocation12], %s1223_s30, %s1223_s30, %s1224_s14  }
  0x41   :  { %1211 = dma.done.wait [#allocation3], 2048  }
  0x42   :  { %1212 = vsyncadd [#allocation3], 4294965248 }
  0x43   :  { %1213 = dma.done.wait [#allocation6], 4096  }
  0x44   :  { %1214 = vsyncadd [#allocation6], 4294963200 }
  0x45   :  { %1215 = dma.done.wait [#allocation9], 4096  }
  0x46   :  { %1216 = vsyncadd [#allocation9], 4294963200 }
  0x47   :  { %1217 = dma.done.wait [#allocation12], 2048  }
  0x48   :  { %1218 = vsyncadd [#allocation12], 4294965248  ;;  %v1229_v0 = vmov 0.0   ;;  %vm1230_vm0 = vmmov 0   ;;  %v143_v1 = vld [vmem:[#allocation2 + $0x78] sm:$0xff]  ;;  %v142_v2 = vld [vmem:[#allocation2 + $0x70] sm:$0xff] }
  0x49   :  { %846 = vmatprep.subr.mxu0 %v1229_v0  ;;  %878 = vmatprep.mubr.msk.f32.mxu0 %vm1230_vm0, %v1229_v0  ;;  %v141_v3 = vld [vmem:[#allocation2 + $0x68] sm:$0xff]  ;;  %v140_v4 = vld [vmem:[#allocation2 + $0x60] sm:$0xff]  ;;  %v236_v5 = vld [vmem:[#allocation5 + $0x78] sm:$0xff]  ;;  %s1231_s25 = smov [#allocation13]  }
  0x4a   :  { %881 = vmatprep.subr.mxu1 %v1229_v0  ;;  %913 = vmatprep.mubr.msk.f32.mxu1 %vm1230_vm0, %v1229_v0  ;;  %v139_v6 = vld [vmem:[#allocation2 + $0x58] sm:$0xff]  ;;  %v235_v7 = vld [vmem:[#allocation5 + $0x70] sm:$0xff]  ;;  %v234_v8 = vld [vmem:[#allocation5 + $0x68] sm:$0xff]  ;;  %s726_s7 = sshll.u32 %s1231_s25, 4  ;;  %s727_s7 = int_to_ptr.vmem [resolvable:$true] %s726_s7 }
  0x4b   :  { %847 = vmatpush3.msra.mxu0 %v143_v1  ;;  %882 = vmatpush3.msra.mxu1 %v236_v5  ;;  %v138_v9 = vld [vmem:[#allocation2 + $0x50] sm:$0xff]  ;;  %v233_v10 = vld [vmem:[#allocation5 + $0x60] sm:$0xff]  ;;  %v137_v11 = vld [vmem:[#allocation2 + $0x48] sm:$0xff]  ;;  %s1191_s26 = scalar_lea.vmem %s727_s7, 128  ;;  %p1196_p3 = scmp.lt.s32.totalorder %s727_s7, %s727_s7 }
  0x4c   :  { %848 = vmatprep.subr.mxu0 %v1229_v0  ;;  %883 = vmatprep.subr.mxu1 %v1229_v0  ;;  %v232_v12 = vld [vmem:[#allocation5 + $0x58] sm:$0xff]  ;;  %v136_v13 = vld [vmem:[#allocation2 + $0x40] sm:$0xff]  ;;  %v231_v14 = vld [vmem:[#allocation5 + $0x50] sm:$0xff]  ;;  %p1192_p2 = scmp.ne.s32.totalorder %s727_s7, %s1191_s26  ;;  %p1197_p4 = scmp.lt.s32.totalorder %s1191_s26, %s1191_s26 }
  0x4d   :  { %849 = vmatpush3.msra.mxu0 %v142_v2  ;;  %884 = vmatpush3.msra.mxu1 %v235_v7  ;;  %v135_v15 = vld [vmem:[#allocation2 + $0x38] sm:$0xff]  ;;  %v230_v16 = vld [vmem:[#allocation5 + $0x48] sm:$0xff]  ;;  %v134_v17 = vld [vmem:[#allocation2 + $0x30] sm:$0xff] }
  0x4e   :  { %850 = vmatprep.subr.mxu0 %v1229_v0  ;;  %885 = vmatprep.subr.mxu1 %v1229_v0  ;;  %v229_v18 = vld [vmem:[#allocation5 + $0x40] sm:$0xff]  ;;  %v133_v19 = vld [vmem:[#allocation2 + $0x28] sm:$0xff]  ;;  %v228_v20 = vld [vmem:[#allocation5 + $0x38] sm:$0xff]  ;;  %p1198_p5 = por %p1197_p4, %p1196_p3 }
  0x4f   :  { %851 = vmatpush3.msra.mxu0 %v141_v3  ;;  %886 = vmatpush3.msra.mxu1 %v234_v8  ;;  %v132_v21 = vld [vmem:[#allocation2 + $0x20] sm:$0xff]  ;;  %v227_v22 = vld [vmem:[#allocation5 + $0x30] sm:$0xff]  ;;  %v131_v23 = vld [vmem:[#allocation2 + $0x18] sm:$0xff] }
  0x50   :  { %852 = vmatprep.subr.mxu0 %v1229_v0  ;;  %887 = vmatprep.subr.mxu1 %v1229_v0  ;;  %v226_v24 = vld [vmem:[#allocation5 + $0x28] sm:$0xff]  ;;  %v130_v25 = vld [vmem:[#allocation2 + $0x10] sm:$0xff]  ;;  %v225_v26 = vld [vmem:[#allocation5 + $0x20] sm:$0xff]  ;;  %p1199_p6 = pnand %p1198_p5, %p1192_p2 }
  0x51   :  { %853 = vmatpush3.msra.mxu0 %v140_v4  ;;  %888 = vmatpush3.msra.mxu1 %v233_v10  ;;  %v129_v27 = vld [vmem:[#allocation2 + $0x8] sm:$0xff]  ;;  %v224_v28 = vld [vmem:[#allocation5 + $0x18] sm:$0xff]  ;;  %v128_v29 = vld [vmem:[#allocation2] sm:$0xff] }
  0x52   :  { %854 = vmatprep.subr.mxu0 %v1229_v0  ;;  %889 = vmatprep.subr.mxu1 %v1229_v0  ;;  %v127_v30 = vld [vmem:[%s1486_s0] sm:$0xff]  ;;  %v223_v31 = vld [vmem:[#allocation5 + $0x10] sm:$0xff]  ;;  %v222_v32 = vld [vmem:[#allocation5 + $0x8] sm:$0xff] }
  0x53   :  { %855 = vmatpush3.msra.mxu0 %v139_v6  ;;  %890 = vmatpush3.msra.mxu1 %v232_v12  ;;  %v221_v33 = vld [vmem:[#allocation5] sm:$0xff]  ;;  %v344_v38 = vld [vmem:[#allocation7 + $0x78] sm:$0xff]  ;;  %v343_v39 = vld [vmem:[#allocation7 + $0x70] sm:$0xff] }
  0x54   :  { %856 = vmatprep.subr.mxu0 %v1229_v0  ;;  %891 = vmatprep.subr.mxu1 %v1229_v0  ;;  %v738_v34 = vld [vmem:[%s1488_s2] ss:$0 sm:$0xff]  ;;  %v342_v46 = vld [vmem:[#allocation7 + $0x68] sm:$0xff]  ;;  %v340_v48 = vld [vmem:[#allocation7 + $0x58] sm:$0xff] }
  0x55   :  { %857 = vmatpush3.msra.mxu0 %v138_v9  ;;  %892 = vmatpush3.msra.mxu1 %v231_v14  ;;  %v739_v40 = vld [vmem:[%s1490_s4] ss:$0 sm:$0xff]  ;;  %v339_v49 = vld [vmem:[#allocation7 + $0x50] sm:$0xff]  ;;  %v338_v50 = vld [vmem:[#allocation7 + $0x48] sm:$0xff] }
  0x56   :  { %858 = vmatprep.subr.mxu0 %v1229_v0  ;;  %893 = vmatprep.subr.mxu1 %v1229_v0  ;;  %v341_v47 = vld [vmem:[#allocation7 + $0x60] sm:$0xff]  ;;  %v336_v52 = vld [vmem:[#allocation7 + $0x38] sm:$0xff]  ;;  %v335_v53 = vld [vmem:[#allocation7 + $0x30] sm:$0xff] }
  0x57   :  { %859 = vmatpush3.msra.mxu0 %v137_v11  ;;  %894 = vmatpush3.msra.mxu1 %v230_v16  ;;  %v337_v51 = vld [vmem:[#allocation7 + $0x40] sm:$0xff]  ;;  %v334_v54 = vld [vmem:[#allocation7 + $0x28] sm:$0xff]  ;;  %v332_v56 = vld [vmem:[#allocation7 + $0x18] sm:$0xff] }
  0x58   :  { %860 = vmatprep.subr.mxu0 %v1229_v0  ;;  %895 = vmatprep.subr.mxu1 %v1229_v0  ;;  %v333_v55 = vld [vmem:[#allocation7 + $0x20] sm:$0xff]  ;;  %v331_v57 = vld [vmem:[#allocation7 + $0x10] sm:$0xff]  ;;  %v330_v58 = vld [vmem:[#allocation7 + $0x8] sm:$0xff] }
  0x59   :  { %861 = vmatpush3.msra.mxu0 %v136_v13  ;;  %896 = vmatpush3.msra.mxu1 %v229_v18  ;;  %v329_v59 = vld [vmem:[#allocation7] sm:$0xff]  ;;  %v439_v60 = vld [vmem:[#allocation8 + $0x78] sm:$0xff]  ;;  %v438_v61 = vld [vmem:[#allocation8 + $0x70] sm:$0xff] }
  0x5a   :  { %862 = vmatprep.subr.mxu0 %v1229_v0  ;;  %897 = vmatprep.subr.mxu1 %v1229_v0  ;;  %v437_v62 = vld [vmem:[#allocation8 + $0x68] sm:$0xff]  ;;  %v436_v63 = vld [vmem:[#allocation8 + $0x60] sm:$0xff]  ;;  %v435_v1 = vld [vmem:[#allocation8 + $0x58] sm:$0xff] }
  0x5b   :  { %863 = vmatpush3.msra.mxu0 %v135_v15  ;;  %898 = vmatpush3.msra.mxu1 %v228_v20  ;;  %v434_v2 = vld [vmem:[#allocation8 + $0x50] sm:$0xff]  ;;  %v433_v3 = vld [vmem:[#allocation8 + $0x48] sm:$0xff]  ;;  %v432_v4 = vld [vmem:[#allocation8 + $0x40] sm:$0xff] }
  0x5c   :  { %864 = vmatprep.subr.mxu0 %v1229_v0  ;;  %899 = vmatprep.subr.mxu1 %v1229_v0  ;;  %v431_v5 = vld [vmem:[#allocation8 + $0x38] sm:$0xff]  ;;  %v430_v6 = vld [vmem:[#allocation8 + $0x30] sm:$0xff]  ;;  %v429_v7 = vld [vmem:[#allocation8 + $0x28] sm:$0xff] }
  0x5d   :  { %865 = vmatpush3.msra.mxu0 %v134_v17  ;;  %900 = vmatpush3.msra.mxu1 %v227_v22  ;;  %v428_v8 = vld [vmem:[#allocation8 + $0x20] sm:$0xff]  ;;  %v427_v20 = vld [vmem:[#allocation8 + $0x18] sm:$0xff]  ;;  %v425_v22 = vld [vmem:[#allocation8 + $0x8] sm:$0xff] }
  0x5e   :  { %866 = vmatprep.subr.mxu0 %v1229_v0  ;;  %901 = vmatprep.subr.mxu1 %v1229_v0 }
  0x5f   :  { %867 = vmatpush3.msra.mxu0 %v133_v19  ;;  %902 = vmatpush3.msra.mxu1 %v226_v24  ;;  %v740_v24 = vld [vmem:[%s1492_s6] ss:$0 sm:$0xff] }
  0x60   :  { %868 = vmatprep.subr.mxu0 %v1229_v0  ;;  %903 = vmatprep.subr.mxu1 %v1229_v0 }
  0x61   :  { %869 = vmatpush3.msra.mxu0 %v132_v21  ;;  %904 = vmatpush3.msra.mxu1 %v225_v26  ;;  %v426_v21 = vld [vmem:[#allocation8 + $0x10] sm:$0xff] }
  0x62   :  { %870 = vmatprep.subr.mxu0 %v1229_v0  ;;  %905 = vmatprep.subr.mxu1 %v1229_v0 }
  0x63   :  { %871 = vmatpush3.msra.mxu0 %v131_v23  ;;  %906 = vmatpush3.msra.mxu1 %v224_v28  ;;  %v424_v23 = vld [vmem:[#allocation8] sm:$0xff] }
  0x64   :  { %872 = vmatprep.subr.mxu0 %v1229_v0  ;;  %907 = vmatprep.subr.mxu1 %v1229_v0 }
  0x65   :  { %873 = vmatpush3.msra.mxu0 %v130_v25  ;;  %908 = vmatpush3.msra.mxu1 %v223_v31  ;;  %v546_v31 = vld [vmem:[#allocation10 + $0x70] sm:$0xff] }
  0x66   :  { %874 = vmatprep.subr.mxu0 %v1229_v0  ;;  %909 = vmatprep.subr.mxu1 %v1229_v0 }
  0x67   :  { %875 = vmatpush3.msra.mxu0 %v129_v27  ;;  %910 = vmatpush3.msra.mxu1 %v222_v32  ;;  %v741_v32 = vld [vmem:[%s1494_s8] ss:$0 sm:$0xff] }
  0x68   :  { %876 = vmatprep.subr.mxu0 %v1229_v0  ;;  %911 = vmatprep.subr.mxu1 %v1229_v0 }
  0x69   :  { %877 = vmatpush3.msra.mxu0 %v128_v29  ;;  %912 = vmatpush3.msra.mxu1 %v221_v33 }
  0x6a   :  { %879 = vmatmul.mubr.f32.vlgmr.msra.gmra.mxu0 %v127_v30  ;;  %916 = vmatprep.subr.mxu0 %v1229_v0  ;;  %v547_v30 = vld [vmem:[#allocation10 + $0x78] sm:$0xff] }
  0x6b   :  { %948 = vmatprep.mubr.msk.f32.mxu0 %vm1230_vm0, %v1229_v0  ;;  %951 = vmatprep.subr.mxu1 %v1229_v0 }
  0x6c   :  { %917 = vmatpush3.msra.mxu0 %v344_v38  ;;  %v545_v38 = vld [vmem:[#allocation10 + $0x68] sm:$0xff] }
  0x6d   :  { %918 = vmatprep.subr.mxu0 %v1229_v0 }
  0x6e   :  { %919 = vmatpush3.msra.mxu0 %v343_v39  ;;  %v544_v39 = vld [vmem:[#allocation10 + $0x60] sm:$0xff] }
  0x6f   :  { %920 = vmatprep.subr.mxu0 %v1229_v0 }
  0x70   :  { %921 = vmatpush3.msra.mxu0 %v342_v46  ;;  %v537_v46 = vld [vmem:[#allocation10 + $0x28] sm:$0xff] }
  0x71   :  { %922 = vmatprep.subr.mxu0 %v1229_v0 }
  0x72   :  { %923 = vmatpush3.msra.mxu0 %v341_v47  ;;  %v536_v47 = vld [vmem:[#allocation10 + $0x20] sm:$0xff] }
  0x73   :  { %924 = vmatprep.subr.mxu0 %v1229_v0 }
  0x74   :  { %925 = vmatpush3.msra.mxu0 %v340_v48  ;;  %v535_v48 = vld [vmem:[#allocation10 + $0x18] sm:$0xff] }
  0x75   :  { %926 = vmatprep.subr.mxu0 %v1229_v0 }
  0x76   :  { %927 = vmatpush3.msra.mxu0 %v339_v49  ;;  %v534_v49 = vld [vmem:[#allocation10 + $0x10] sm:$0xff] }
  0x77   :  { %928 = vmatprep.subr.mxu0 %v1229_v0 }
  0x78   :  { %929 = vmatpush3.msra.mxu0 %v338_v50  ;;  %v533_v50 = vld [vmem:[#allocation10 + $0x8] sm:$0xff] }
  0x79   :  { %930 = vmatprep.subr.mxu0 %v1229_v0 }
  0x7a   :  { %931 = vmatpush3.msra.mxu0 %v337_v51  ;;  %v532_v51 = vld [vmem:[#allocation10] sm:$0xff] }
  0x7b   :  { %932 = vmatprep.subr.mxu0 %v1229_v0 }
  0x7c   :  { %933 = vmatpush3.msra.mxu0 %v336_v52  ;;  %v641_v52 = vld [vmem:[#allocation11 + $0x78] sm:$0xff] }
  0x7d   :  { %934 = vmatprep.subr.mxu0 %v1229_v0 }
  0x7e   :  { %935 = vmatpush3.msra.mxu0 %v335_v53  ;;  %v640_v53 = vld [vmem:[#allocation11 + $0x70] sm:$0xff] }
  0x7f   :  { %936 = vmatprep.subr.mxu0 %v1229_v0 }
  0x80   :  { %937 = vmatpush3.msra.mxu0 %v334_v54  ;;  %v639_v54 = vld [vmem:[#allocation11 + $0x68] sm:$0xff] }
  0x81   :  { %938 = vmatprep.subr.mxu0 %v1229_v0 }
  0x82   :  { %939 = vmatpush3.msra.mxu0 %v333_v55  ;;  %v638_v55 = vld [vmem:[#allocation11 + $0x60] sm:$0xff] }
  0x83   :  { %940 = vmatprep.subr.mxu0 %v1229_v0 }
  0x84   :  { %941 = vmatpush3.msra.mxu0 %v332_v56  ;;  %v637_v56 = vld [vmem:[#allocation11 + $0x58] sm:$0xff] }
  0x85   :  { %942 = vmatprep.subr.mxu0 %v1229_v0 }
  0x86   :  { %943 = vmatpush3.msra.mxu0 %v331_v57  ;;  %v636_v57 = vld [vmem:[#allocation11 + $0x50] sm:$0xff] }
  0x87   :  { %944 = vmatprep.subr.mxu0 %v1229_v0 }
  0x88   :  { %945 = vmatpush3.msra.mxu0 %v330_v58  ;;  %v635_v58 = vld [vmem:[#allocation11 + $0x48] sm:$0xff] }
  0x89   :  { %946 = vmatprep.subr.mxu0 %v1229_v0 }
  0x8a   :  { %947 = vmatpush3.msra.mxu0 %v329_v59  ;;  %v634_v59 = vld [vmem:[#allocation11 + $0x40] sm:$0xff] }
  0x8b   :  { %986 = vmatprep.subr.mxu0 %v1229_v0 }
 0x12a   :  { %v217_v35 = vpop.f32.mrf.mxu0 }
 0x12b   :  { %v1384_v36 = vadd.f32 %v738_v34, %v217_v35 }
 0x12c   :  { %v880_v37 = vpop.f32.mrf.mxu0 }
 0x12d   :  { %914 = vmatmul.mubr.f32.vlgmr.msra.gmra.mxu1 %v1384_v36 }
 0x12e   :  { %983 = vmatprep.mubr.msk.f32.mxu1 %vm1230_vm0, %v1229_v0  ;;  %952 = vmatpush3.msra.mxu1 %v439_v60  ;;  %v633_v60 = vld [vmem:[#allocation11 + $0x38] sm:$0xff] }
 0x12f   :  { %953 = vmatprep.subr.mxu1 %v1229_v0 }
 0x130   :  { %954 = vmatpush3.msra.mxu1 %v438_v61  ;;  %v632_v61 = vld [vmem:[#allocation11 + $0x30] sm:$0xff] }
 0x131   :  { %955 = vmatprep.subr.mxu1 %v1229_v0 }
 0x132   :  { %956 = vmatpush3.msra.mxu1 %v437_v62  ;;  %v631_v62 = vld [vmem:[#allocation11 + $0x28] sm:$0xff] }
 0x133   :  { %957 = vmatprep.subr.mxu1 %v1229_v0 }
 0x134   :  { %958 = vmatpush3.msra.mxu1 %v436_v63  ;;  %v630_v63 = vld [vmem:[#allocation11 + $0x20] sm:$0xff] }
 0x135   :  { %959 = vmatprep.subr.mxu1 %v1229_v0 }
 0x136   :  { %960 = vmatpush3.msra.mxu1 %v435_v1  ;;  %v629_v1 = vld [vmem:[#allocation11 + $0x18] sm:$0xff] }
 0x137   :  { %961 = vmatprep.subr.mxu1 %v1229_v0 }
 0x138   :  { %962 = vmatpush3.msra.mxu1 %v434_v2 }
 0x139   :  { %963 = vmatprep.subr.mxu1 %v1229_v0 }
 0x13a   :  { %964 = vmatpush3.msra.mxu1 %v433_v3 }
 0x13b   :  { %965 = vmatprep.subr.mxu1 %v1229_v0 }
 0x13c   :  { %966 = vmatpush3.msra.mxu1 %v432_v4 }
 0x13d   :  { %967 = vmatprep.subr.mxu1 %v1229_v0 }
 0x13e   :  { %968 = vmatpush3.msra.mxu1 %v431_v5 }
 0x13f   :  { %969 = vmatprep.subr.mxu1 %v1229_v0 }
 0x140   :  { %970 = vmatpush3.msra.mxu1 %v430_v6 }
 0x141   :  { %971 = vmatprep.subr.mxu1 %v1229_v0 }
 0x142   :  { %972 = vmatpush3.msra.mxu1 %v429_v7 }
 0x143   :  { %973 = vmatprep.subr.mxu1 %v1229_v0 }
 0x144   :  { %974 = vmatpush3.msra.mxu1 %v428_v8 }
 0x145   :  { %975 = vmatprep.subr.mxu1 %v1229_v0 }
 0x146   :  { %976 = vmatpush3.msra.mxu1 %v427_v20 }
 0x147   :  { %977 = vmatprep.subr.mxu1 %v1229_v0 }
 0x148   :  { %978 = vmatpush3.msra.mxu1 %v426_v21  ;;  %v743_v21 = vld [vmem:[%s1498_s12] ss:$0 sm:$0xff] }
 0x149   :  { %979 = vmatprep.subr.mxu1 %v1229_v0 }
 0x14a   :  { %980 = vmatpush3.msra.mxu1 %v425_v22 }
 0x14b   :  { %981 = vmatprep.subr.mxu1 %v1229_v0 }
 0x14c   :  { %982 = vmatpush3.msra.mxu1 %v424_v23 }
 0x14d   :  { %1021 = vmatprep.subr.mxu1 %v1229_v0 }
 0x1ed   :  { %v310_v41 = vpop.f32.mrf.mxu1 }
 0x1ee   :  { %v311_v42 = vadd.f32 %v739_v40, %v310_v41  ;;  %v543_v40 = vld [vmem:[#allocation10 + $0x58] sm:$0xff]  ;;  %v542_v41 = vld [vmem:[#allocation10 + $0x50] sm:$0xff] }
 0x1ef   :  { %v915_v43 = vpop.f32.mrf.mxu1 }
 0x1f0   :  { %v1394_v44 = vmax.f32 %v311_v42, 0.0  ;;  %v541_v42 = vld [vmem:[#allocation10 + $0x48] sm:$0xff]  ;;  %v540_v43 = vld [vmem:[#allocation10 + $0x40] sm:$0xff] }
 0x1f2   :  { %315 = vadd.xlane.f32.xlu0 %v1394_v44  ;;  %v318_v45 = vmul.f32 %v1394_v44, %v1394_v44 }
 0x1f6   :  { %319 = vadd.xlane.f32.xlu0 %v318_v45  ;;  %v538_v45 = vld [vmem:[#allocation10 + $0x30] sm:$0xff] }
 0x27b   :  { %v316_v9 = vpop.xlane.xlu0 %315 }
 0x27c   :  { %v317_v10 = vmul.f32 0.03125, %v316_v9 }
 0x27e   :  { %v322_v12 = vmul.f32 %v317_v10, %v317_v10  ;;  %v325_v17 = vsub.f32 %v1394_v44, %v317_v10  ;;  %v539_v44 = vld [vmem:[#allocation10 + $0x38] sm:$0xff] }
 0x27f   :  { %v320_v11 = vpop.xlane.xlu0 %319 }
 0x280   :  { %v321_v13 = vmul.f32 0.03125, %v320_v11 }
 0x282   :  { %v323_v14 = vsub.f32 %v321_v13, %v322_v12  ;;  %v628_v13 = vld [vmem:[#allocation11 + $0x10] sm:$0xff] }
 0x284   :  { %v324_v15 = vmax.f32 %v323_v14, 0.0  ;;  %v627_v14 = vld [vmem:[#allocation11 + $0x8] sm:$0xff] }
 0x286   :  { %v326_v16 = vadd.f32 1e-05, %v324_v15  ;;  %v626_v15 = vld [vmem:[#allocation11] sm:$0xff] }
 0x288   :  { %1067 = vrsqrt.f32 %v326_v16  ;;  %v742_v16 = vld [vmem:[%s1496_s10] ss:$0 sm:$0xff] }
 0x295   :  { %v1068_v18 = vpop.eup %1067 }
 0x296   :  { %v328_v19 = vmul.f32 %v1068_v18, %v325_v17 }
 0x298   :  { %949 = vmatmul.mubr.f32.vlgmr.msra.gmra.mxu0 %v328_v19 }
 0x299   :  { %1018 = vmatprep.mubr.msk.f32.mxu0 %vm1230_vm0, %v1229_v0  ;;  %987 = vmatpush3.msra.mxu0 %v547_v30 }
 0x29a   :  { %988 = vmatprep.subr.mxu0 %v1229_v0 }
 0x29b   :  { %989 = vmatpush3.msra.mxu0 %v546_v31 }
 0x29c   :  { %990 = vmatprep.subr.mxu0 %v1229_v0 }
 0x29d   :  { %991 = vmatpush3.msra.mxu0 %v545_v38 }
 0x29e   :  { %992 = vmatprep.subr.mxu0 %v1229_v0 }
 0x29f   :  { %993 = vmatpush3.msra.mxu0 %v544_v39 }
 0x2a0   :  { %994 = vmatprep.subr.mxu0 %v1229_v0 }
 0x2a1   :  { %995 = vmatpush3.msra.mxu0 %v543_v40 }
 0x2a2   :  { %996 = vmatprep.subr.mxu0 %v1229_v0 }
 0x2a3   :  { %997 = vmatpush3.msra.mxu0 %v542_v41 }
 0x2a4   :  { %998 = vmatprep.subr.mxu0 %v1229_v0 }
 0x2a5   :  { %999 = vmatpush3.msra.mxu0 %v541_v42 }
 0x2a6   :  { %1000 = vmatprep.subr.mxu0 %v1229_v0 }
 0x2a7   :  { %1001 = vmatpush3.msra.mxu0 %v540_v43 }
 0x2a8   :  { %1002 = vmatprep.subr.mxu0 %v1229_v0 }
 0x2a9   :  { %1003 = vmatpush3.msra.mxu0 %v539_v44 }
 0x2aa   :  { %1004 = vmatprep.subr.mxu0 %v1229_v0 }
 0x2ab   :  { %1005 = vmatpush3.msra.mxu0 %v538_v45 }
 0x2ac   :  { %1006 = vmatprep.subr.mxu0 %v1229_v0 }
 0x2ad   :  { %1007 = vmatpush3.msra.mxu0 %v537_v46 }
 0x2ae   :  { %1008 = vmatprep.subr.mxu0 %v1229_v0 }
 0x2af   :  { %1009 = vmatpush3.msra.mxu0 %v536_v47 }
 0x2b0   :  { %1010 = vmatprep.subr.mxu0 %v1229_v0 }
 0x2b1   :  { %1011 = vmatpush3.msra.mxu0 %v535_v48 }
 0x2b2   :  { %1012 = vmatprep.subr.mxu0 %v1229_v0 }
 0x2b3   :  { %1013 = vmatpush3.msra.mxu0 %v534_v49 }
 0x2b4   :  { %1014 = vmatprep.subr.mxu0 %v1229_v0 }
 0x2b5   :  { %1015 = vmatpush3.msra.mxu0 %v533_v50 }
 0x2b6   :  { %1016 = vmatprep.subr.mxu0 %v1229_v0 }
 0x2b7   :  { %1017 = vmatpush3.msra.mxu0 %v532_v51 }
 0x358   :  { %v418_v25 = vpop.f32.mrf.mxu0 }
 0x359   :  { %v419_v26 = vadd.f32 %v740_v24, %v418_v25 }
 0x35a   :  { %v950_v27 = vpop.f32.mrf.mxu0 }
 0x35b   :  { %v422_v28 = vmax.f32 %v419_v26, 0.0 }
 0x35d   :  { %v423_v29 = vadd.f32 %v422_v28, %v1384_v36 }
 0x35f   :  { %984 = vmatmul.mubr.f32.vlgmr.msra.gmra.mxu1 %v423_v29 }
 0x360   :  { %1053 = vmatprep.mubr.msk.f32.mxu1 %vm1230_vm0, %v1229_v0  ;;  %1022 = vmatpush3.msra.mxu1 %v641_v52 }
 0x361   :  { %1023 = vmatprep.subr.mxu1 %v1229_v0 }
 0x362   :  { %1024 = vmatpush3.msra.mxu1 %v640_v53 }
 0x363   :  { %1025 = vmatprep.subr.mxu1 %v1229_v0 }
 0x364   :  { %1026 = vmatpush3.msra.mxu1 %v639_v54 }
 0x365   :  { %1027 = vmatprep.subr.mxu1 %v1229_v0 }
 0x366   :  { %1028 = vmatpush3.msra.mxu1 %v638_v55 }
 0x367   :  { %1029 = vmatprep.subr.mxu1 %v1229_v0 }
 0x368   :  { %1030 = vmatpush3.msra.mxu1 %v637_v56 }
 0x369   :  { %1031 = vmatprep.subr.mxu1 %v1229_v0 }
 0x36a   :  { %1032 = vmatpush3.msra.mxu1 %v636_v57 }
 0x36b   :  { %1033 = vmatprep.subr.mxu1 %v1229_v0 }
 0x36c   :  { %1034 = vmatpush3.msra.mxu1 %v635_v58 }
 0x36d   :  { %1035 = vmatprep.subr.mxu1 %v1229_v0 }
 0x36e   :  { %1036 = vmatpush3.msra.mxu1 %v634_v59 }
 0x36f   :  { %1037 = vmatprep.subr.mxu1 %v1229_v0 }
 0x370   :  { %1038 = vmatpush3.msra.mxu1 %v633_v60 }
 0x371   :  { %1039 = vmatprep.subr.mxu1 %v1229_v0 }
 0x372   :  { %1040 = vmatpush3.msra.mxu1 %v632_v61 }
 0x373   :  { %1041 = vmatprep.subr.mxu1 %v1229_v0 }
 0x374   :  { %1042 = vmatpush3.msra.mxu1 %v631_v62 }
 0x375   :  { %1043 = vmatprep.subr.mxu1 %v1229_v0 }
 0x376   :  { %1044 = vmatpush3.msra.mxu1 %v630_v63 }
 0x377   :  { %1045 = vmatprep.subr.mxu1 %v1229_v0 }
 0x378   :  { %1046 = vmatpush3.msra.mxu1 %v629_v1 }
 0x379   :  { %1047 = vmatprep.subr.mxu1 %v1229_v0 }
 0x37a   :  { %1048 = vmatpush3.msra.mxu1 %v628_v13 }
 0x37b   :  { %1049 = vmatprep.subr.mxu1 %v1229_v0 }
 0x37c   :  { %1050 = vmatpush3.msra.mxu1 %v627_v14 }
 0x37d   :  { %1051 = vmatprep.subr.mxu1 %v1229_v0 }
 0x37e   :  { %1052 = vmatpush3.msra.mxu1 %v626_v15 }
 0x41f   :  { %v513_v33 = vpop.f32.mrf.mxu1 }
 0x420   :  { %v514_v34 = vadd.f32 %v741_v32, %v513_v33 }
 0x421   :  { %v985_v35 = vpop.f32.mrf.mxu1 }
 0x422   :  { %v1443_v36 = vmax.f32 %v514_v34, 0.0 }
 0x424   :  { %518 = vadd.xlane.f32.xlu1 %v1443_v36  ;;  %v521_v37 = vmul.f32 %v1443_v36, %v1443_v36 }
 0x428   :  { %522 = vadd.xlane.f32.xlu1 %v521_v37 }
 0x4ad   :  { %v519_v2 = vpop.xlane.xlu1 %518 }
 0x4ae   :  { %v520_v3 = vmul.f32 0.03125, %v519_v2 }
 0x4b0   :  { %v525_v5 = vmul.f32 %v520_v3, %v520_v3  ;;  %v528_v10 = vsub.f32 %v1443_v36, %v520_v3 }
 0x4b1   :  { %v523_v4 = vpop.xlane.xlu1 %522 }
 0x4b2   :  { %v524_v6 = vmul.f32 0.03125, %v523_v4 }
 0x4b4   :  { %v526_v7 = vsub.f32 %v524_v6, %v525_v5 }
 0x4b6   :  { %v527_v8 = vmax.f32 %v526_v7, 0.0 }
 0x4b8   :  { %v529_v9 = vadd.f32 1e-05, %v527_v8 }
 0x4ba   :  { %1069 = vrsqrt.f32 %v529_v9 }
 0x4c7   :  { %v1070_v11 = vpop.eup %1069 }
 0x4c8   :  { %v531_v12 = vmul.f32 %v1070_v11, %v528_v10 }
 0x4ca   :  { %1019 = vmatmul.mubr.f32.vlgmr.msra.gmra.mxu0 %v531_v12 }
 0x58a   :  { %v621_v17 = vpop.f32.mrf.mxu0 }
 0x58b   :  { %v622_v18 = vadd.f32 %v742_v16, %v621_v17 }
 0x58c   :  { %v1020_v19 = vpop.f32.mrf.mxu0 }
 0x58d   :  { %v625_v20 = vmax.f32 %v622_v18, 0.0 }
 0x58f   :  { %1054 = vmatmul.mubr.f32.vlgmr.msra.gmra.mxu1 %v625_v20 }
 0x64f   :  { %v715_v22 = vpop.f32.mrf.mxu1 }
 0x650   :  { %v716_v23 = vadd.f32 %v743_v21, %v715_v22 }
 0x651   :  { %v1055_v0 = vpop.f32.mrf.mxu1 }
 0x652   :  { %719 = vst [vmem:[#allocation13] sm:$0xff] %v716_v23 }
 0x653   :  { %1202 = shalt.err (!%p1199_p6)
}
 0x654   :  { %729 = dma.vmem_to_hbm [thread:$0]  %s727_s7, 128, %s1499_s13, [#allocation4]  }
 0x655   :  { %1219 = dma.done.wait [#allocation4], 128  }
 0x656   :  { %1220 = vsyncadd [#allocation4], 4294967168 }
 0x657   :  { %733 = vsyncpa [#allocation3], 1 }
 0x658   :  { %734 = vsyncpa [#allocation6], 1 }
 0x659   :  { %735 = vsyncpa [#allocation9], 1 }
 0x65a   :  { %736 = vsyncpa [#allocation12], 1 }
 0x65b   :  { %737 = vsyncpa [#allocation4], 1 }

</bundles_post_ra>
